<compile_context>
chip_gen: v7x
topology: tpu7x:2x2x1
jax: 0.10.0
libtpu: 0.0.40
codegen_flags: <defaults>
</compile_context>

<pallas_src>
import functools

import jax
import jax.numpy as jnp
import numpy as np
from jax.experimental import pallas as pl
from jax.experimental.pallas import tpu as pltpu

BN_EPS = 1e-5  # torch BatchNorm1d default


def _cdiv(a, b):
    return -(-a // b)


def _pick_vmem_limit_bytes():
    """Scoped-VMEM budget sized per generation (never more than half capacity)."""
    try:
        cap = pltpu.get_tpu_info().vmem_capacity_bytes
    except Exception:
        return 32 * 1024 * 1024  # conservative fallback, safe on every generation
    return int(min(cap // 2, 64 * 1024 * 1024))


def _conv_even_odd(x_e, x_o, w_flat, *, k, thalf):
    """Conv1d('same', odd K) of one sample, split into even/odd output phases.

    x_e, x_o : (C_in, L/2 + pad) -- even / odd lanes of the zero-padded input.
    w_flat   : (C_out, K*C_in), column block j holds weight[:, :, j].
    Returns y_even, y_odd : (C_out, L/2) float32 with y_even[:, s] = conv[:, 2s],
    y_odd[:, s] = conv[:, 2s+1].
    """
    rows_e, rows_o = [], []
    for j in range(k):  # static unroll; shifted slices are cheap XLU lane shifts
        if j % 2 == 0:
            sh = j // 2
            rows_e.append(x_e[:, sh:sh + thalf])
            rows_o.append(x_o[:, sh:sh + thalf])
        else:
            sh_e = j // 2
            sh_o = (j + 1) // 2
            rows_e.append(x_o[:, sh_e:sh_e + thalf])
            rows_o.append(x_e[:, sh_o:sh_o + thalf])
    im_e = jnp.concatenate(rows_e, axis=0)  # (K*C_in, L/2) in-VMEM im2col
    im_o = jnp.concatenate(rows_o, axis=0)
    y_e = jnp.dot(w_flat, im_e, preferred_element_type=jnp.float32)
    y_o = jnp.dot(w_flat, im_o, preferred_element_type=jnp.float32)
    return y_e, y_o


def _stats_kernel(xe_ref, xo_ref, w_ref, s1_ref, s2_ref, *, nb, k, thalf, c_out):
    # Phase 1: per-block per-channel sum and sum-of-squares of the conv output.
    # TODO(synk): one-pass sum/sumsq can lose precision when |mean| >> std; switch to
    # shifted sums / Welford combine if that regime ever matters.
    w = w_ref[...]
    s1 = jnp.zeros((c_out, 1), jnp.float32)
    s2 = jnp.zeros((c_out, 1), jnp.float32)
    for i in range(nb):  # static unroll over samples in this batch block
        y_e, y_o = _conv_even_odd(xe_ref[i], xo_ref[i], w, k=k, thalf=thalf)
        s1 = s1 + jnp.sum(y_e, axis=1, keepdims=True) + jnp.sum(y_o, axis=1, keepdims=True)
        s2 = (s2 + jnp.sum(y_e * y_e, axis=1, keepdims=True)
              + jnp.sum(y_o * y_o, axis=1, keepdims=True))
    s1_ref[0] = s1
    s2_ref[0] = s2


def _apply_kernel(xe_ref, xo_ref, w_ref, scale_ref, shift_ref, out_ref, *, nb, k, thalf):
    # Phase 2: recompute conv, fused BN affine (one FMA), ReLU, MaxPool1d(2) as a
    # VPU max of the two phases; store final (C_out, L/2) layout (lane-dense L/2).
    w = w_ref[...]
    scale = scale_ref[...]  # (C_out, 1): per-channel, broadcast over lanes
    shift = shift_ref[...]
    for i in range(nb):
        y_e, y_o = _conv_even_odd(xe_ref[i], xo_ref[i], w, k=k, thalf=thalf)
        z_e = jnp.maximum(y_e * scale + shift, 0.0)
        z_o = jnp.maximum(y_o * scale + shift, 0.0)
        out_ref[i] = jnp.maximum(z_e, z_o)


def conv_block_forward(x, weight, bias, gamma, beta, *, kernel_size=5, padding=2,
                       use_maxpool=True, block_batch=8, use_bf16=True):
    """Forward of ConvBlock: MaxPool1d(2)(ReLU(BN_train(Conv1d(x)))).

    x: (N, C_in, L) f32, weight: (C_out, C_in, K), bias/gamma/beta: (C_out,).
    Returns (N, C_out, L//2) f32.

    NOTE: the conv bias is dropped inside the kernels. That is exact ONLY because
    BatchNorm runs in training mode (the batch mean absorbs the bias; variance is
    shift-invariant). Do not reuse these kernels with eval-mode / running-stat BN.
    """
    assert use_maxpool, "use_maxpool=False (Identity pool) path not implemented"
    # TODO(synk): support use_maxpool=False by storing both phases interleaved.
    del bias  # cancelled exactly by train-mode BN mean subtraction (see docstring)

    n, c_in, length = x.shape
    c_out, c_in_w, k = weight.shape
    assert c_in_w == c_in
    assert k == kernel_size and k == 2 * padding + 1, "expects odd-K 'same' conv"
    assert length % 2 == 0, "MaxPool1d(2) path assumes even length"

    thalf = length // 2          # pooled length == output lane dimension
    lh = thalf + padding         # length of each even/odd phase of the padded input
    kc = k * c_in

    # Batch blocking: several samples per grid step (amortizes ~0.35us/step and DMA
    # latency); keep >= 2 grid steps when possible so both v7x TensorCores get work.
    nb = max(1, min(block_batch, _cdiv(n, 2)))
    n_blocks = _cdiv(n, nb)
    n_pad = n_blocks * nb

    cdtype = jnp.bfloat16 if use_bf16 else jnp.float32

    # Pad L ('same' conv) and split into even/odd lane phases; batch-pad with zero
    # samples (they contribute exactly 0 to the BN sums since bias is dropped).
    xpad = jnp.pad(x, ((0, n_pad - n), (0, 0), (padding, padding)))
    x_even = xpad[:, :, 0::2].astype(cdtype)   # (n_pad, C_in, lh), length in lanes
    x_odd = xpad[:, :, 1::2].astype(cdtype)
    # w_flat[c, j*C_in + ci] = weight[c, ci, j]  (matches im2col row order)
    w_flat = jnp.transpose(weight, (0, 2, 1)).reshape(c_out, kc).astype(cdtype)

    x_spec = pl.BlockSpec((nb, c_in, lh), lambda b: (b, 0, 0))
    w_spec = pl.BlockSpec((c_out, kc), lambda b: (0, 0))
    cparams = pltpu.CompilerParams(dimension_semantics=("parallel",),
                                   vmem_limit_bytes=_pick_vmem_limit_bytes())

    itemsize = jnp.dtype(cdtype).itemsize
    x_bytes = 2 * n_pad * c_in * lh * itemsize
    w_bytes = c_out * kc * itemsize
    conv_flops = 2 * n_pad * length * kc * c_out

    # ---- Phase 1: conv + per-block per-channel sum / sum-of-squares ----------
    stats_shape = jax.ShapeDtypeStruct((n_blocks, c_out, 1), jnp.float32)
    stats_spec = pl.BlockSpec((1, c_out, 1), lambda b: (b, 0, 0))
    s1, s2 = pl.pallas_call(
        functools.partial(_stats_kernel, nb=nb, k=k, thalf=thalf, c_out=c_out),
        out_shape=(stats_shape, stats_shape),
        grid=(n_blocks,),
        in_specs=[x_spec, x_spec, w_spec],
        out_specs=(stats_spec, stats_spec),
        compiler_params=cparams,
        cost_estimate=pl.CostEstimate(
            flops=conv_flops + 3 * n_pad * length * c_out, transcendentals=0,
            bytes_accessed=x_bytes + w_bytes + 2 * n_blocks * c_out * 4),
    )(x_even, x_odd, w_flat)

    # ---- Tiny glue: fold global train-mode BN stats + gamma/beta -------------
    total = jnp.float32(n * length)                 # true count (batch padding is zero)
    s1_tot = jnp.sum(s1, axis=0)                    # (C_out, 1)
    s2_tot = jnp.sum(s2, axis=0)
    mean = s1_tot / total
    var = jnp.maximum(s2_tot / total - mean * mean, 0.0)   # biased var (train mode)
    scale = gamma.reshape(c_out, 1) * jax.lax.rsqrt(var + BN_EPS)
    shift = beta.reshape(c_out, 1) - mean * scale

    # ---- Phase 2: conv + BN affine + ReLU + MaxPool, final layout ------------
    out = pl.pallas_call(
        functools.partial(_apply_kernel, nb=nb, k=k, thalf=thalf),
        out_shape=jax.ShapeDtypeStruct((n_pad, c_out, thalf), jnp.float32),
        grid=(n_blocks,),
        in_specs=[x_spec, x_spec, w_spec,
                  pl.BlockSpec((c_out, 1), lambda b: (0, 0)),
                  pl.BlockSpec((c_out, 1), lambda b: (0, 0))],
        out_specs=pl.BlockSpec((nb, c_out, thalf), lambda b: (b, 0, 0)),
        compiler_params=cparams,
        cost_estimate=pl.CostEstimate(
            flops=conv_flops + 5 * n_pad * length * c_out, transcendentals=0,
            bytes_accessed=x_bytes + w_bytes + n_pad * c_out * thalf * 4),
    )(x_even, x_odd, w_flat, scale, shift)

    return out if n_pad == n else out[:n]


def conv_block_reference(x, weight, bias, gamma, beta, *, padding=2):
    """Pure-JAX reference mirroring PyTorch ConvBlock.forward (train-mode BN)."""
    y = jax.lax.conv_general_dilated(
        x, weight, window_strides=(1,), padding=[(padding, padding)],
        dimension_numbers=("NCH", "OIH", "NCH"))
    y = y + bias[None, :, None]
    mean = jnp.mean(y, axis=(0, 2), keepdims=True)
    var = jnp.mean((y - mean) ** 2, axis=(0, 2), keepdims=True)
    y = (y - mean) * jax.lax.rsqrt(var + BN_EPS)
    y = y * gamma[None, :, None] + beta[None, :, None]
    y = jnp.maximum(y, 0.0)
    n, c, length = y.shape
    return jnp.max(y.reshape(n, c, length // 2, 2), axis=-1)


if __name__ == "__main__":
    # Shapes consistent with Conv1d(in_channels=4, out_channels=8, k=5, pad=2)
    N, C_IN, C_OUT, L, K, PAD = 2, 4, 8, 16, 5, 2

    key = jax.random.PRNGKey(0)
    kx, kw, kb, kg, kbe = jax.random.split(key, 5)
    x = jax.random.normal(kx, (N, C_IN, L), dtype=jnp.float32)
    weight = jax.random.normal(kw, (C_OUT, C_IN, K), dtype=jnp.float32) * 0.1
    bias = jax.random.normal(kb, (C_OUT,), dtype=jnp.float32) * 0.1
    gamma = 1.0 + 0.1 * jax.random.normal(kg, (C_OUT,), dtype=jnp.float32)
    beta = 0.1 * jax.random.normal(kbe, (C_OUT,), dtype=jnp.float32)

    ref = conv_block_reference(x, weight, bias, gamma, beta, padding=PAD)

    # f32-operand path: tight check against the pure-JAX reference.
    out_f32 = conv_block_forward(x, weight, bias, gamma, beta, kernel_size=K,
                                 padding=PAD, use_maxpool=True, use_bf16=False)
    out_f32 = jax.block_until_ready(out_f32)
    np.testing.assert_allclose(np.asarray(out_f32), np.asarray(ref), rtol=1e-4, atol=1e-4)
    assert out_f32.shape == (N, C_OUT, L // 2)

    # bf16 matmul-operand path (default perf configuration): looser tolerance.
    out_bf16 = conv_block_forward(x, weight, bias, gamma, beta, kernel_size=K,
                                  padding=PAD, use_maxpool=True, use_bf16=True)
    out_bf16 = jax.block_until_ready(out_bf16)
    np.testing.assert_allclose(np.asarray(out_bf16), np.asarray(ref), rtol=3e-2, atol=3e-2)
    assert out_bf16.shape == (N, C_OUT, L // 2)

    print("KERNEL_OK")
</pallas_src>

<mosaic_0001>
module attributes {stable_mosaic.version = 11 : i64} {
  func.func @_stats_kernel(%arg0: i32, %arg1: memref<1x4x10xf32, #tpu.memory_space<vmem>>, %arg2: memref<1x4x10xf32, #tpu.memory_space<vmem>>, %arg3: memref<8x20xf32, #tpu.memory_space<vmem>>, %arg4: memref<1x8x1xf32, #tpu.memory_space<vmem>>, %arg5: memref<1x8x1xf32, #tpu.memory_space<vmem>>) attributes {dimension_semantics = [#tpu.dimension_semantics<parallel>], iteration_bounds = array<i64: 2>, scalar_prefetch = 0 : i64, scratch_operands = 0 : i64, tpu.core_type = #tpu.core_type<tc>, window_params = [{transform_indices = @transform_0, window_bounds = array<i64: 1, 4, 10>}, {transform_indices = @transform_1, window_bounds = array<i64: 1, 4, 10>}, {pipeline_mode = #tpu.pipeline_mode<synchronous>, transform_indices = @transform_2, window_bounds = array<i64: 8, 20>}, {transform_indices = @transform_3, window_bounds = array<i64: 1, 8, 1>}, {transform_indices = @transform_4, window_bounds = array<i64: 1, 8, 1>}]} {
    %c0 = arith.constant 0 : index
    %c0_0 = arith.constant 0 : index
    %0 = vector.load %arg3[%c0, %c0_0] : memref<8x20xf32, #tpu.memory_space<vmem>>, vector<8x20xf32>
    %cst = arith.constant 0.000000e+00 : f32
    %1 = vector.broadcast %cst : f32 to vector<8x1xf32>
    %cst_1 = arith.constant 0.000000e+00 : f32
    %2 = vector.broadcast %cst_1 : f32 to vector<8x1xf32>
    %c0_2 = arith.constant 0 : index
    %c0_3 = arith.constant 0 : index
    %c0_4 = arith.constant 0 : index
    %3 = vector.load %arg1[%c0_2, %c0_3, %c0_4] : memref<1x4x10xf32, #tpu.memory_space<vmem>>, vector<1x4x10xf32>
    %4 = vector.shape_cast %3 : vector<1x4x10xf32> to vector<4x10xf32>
    %c0_5 = arith.constant 0 : index
    %c0_6 = arith.constant 0 : index
    %c0_7 = arith.constant 0 : index
    %5 = vector.load %arg2[%c0_5, %c0_6, %c0_7] : memref<1x4x10xf32, #tpu.memory_space<vmem>>, vector<1x4x10xf32>
    %6 = vector.shape_cast %5 : vector<1x4x10xf32> to vector<4x10xf32>
    %7 = vector.extract_strided_slice %4 {offsets = [0, 0], sizes = [4, 8], strides = [1, 1]} : vector<4x10xf32> to vector<4x8xf32>
    %8 = vector.extract_strided_slice %6 {offsets = [0, 0], sizes = [4, 8], strides = [1, 1]} : vector<4x10xf32> to vector<4x8xf32>
    %9 = vector.extract_strided_slice %6 {offsets = [0, 0], sizes = [4, 8], strides = [1, 1]} : vector<4x10xf32> to vector<4x8xf32>
    %10 = vector.extract_strided_slice %4 {offsets = [0, 1], sizes = [4, 8], strides = [1, 1]} : vector<4x10xf32> to vector<4x8xf32>
    %11 = vector.extract_strided_slice %4 {offsets = [0, 1], sizes = [4, 8], strides = [1, 1]} : vector<4x10xf32> to vector<4x8xf32>
    %12 = vector.extract_strided_slice %6 {offsets = [0, 1], sizes = [4, 8], strides = [1, 1]} : vector<4x10xf32> to vector<4x8xf32>
    %13 = vector.extract_strided_slice %6 {offsets = [0, 1], sizes = [4, 8], strides = [1, 1]} : vector<4x10xf32> to vector<4x8xf32>
    %14 = vector.extract_strided_slice %4 {offsets = [0, 2], sizes = [4, 8], strides = [1, 1]} : vector<4x10xf32> to vector<4x8xf32>
    %15 = vector.extract_strided_slice %4 {offsets = [0, 2], sizes = [4, 8], strides = [1, 1]} : vector<4x10xf32> to vector<4x8xf32>
    %16 = vector.extract_strided_slice %6 {offsets = [0, 2], sizes = [4, 8], strides = [1, 1]} : vector<4x10xf32> to vector<4x8xf32>
    %17 = tpu.concatenate %7, %9, %11, %13, %15 in 0 : vector<4x8xf32>, vector<4x8xf32>, vector<4x8xf32>, vector<4x8xf32>, vector<4x8xf32> -> vector<20x8xf32>
    %18 = tpu.concatenate %8, %10, %12, %14, %16 in 0 : vector<4x8xf32>, vector<4x8xf32>, vector<4x8xf32>, vector<4x8xf32>, vector<4x8xf32> -> vector<20x8xf32>
    %cst_8 = arith.constant dense<0.000000e+00> : vector<8x8xf32>
    %19 = tpu.matmul %0, %17, %cst_8 {dimension_numbers = #tpu.dot_dimension_numbers<[1], [0], [0], [1], [0, 0, 1, 1], [], []>} : vector<8x20xf32>, vector<20x8xf32>, vector<8x8xf32> -> vector<8x8xf32>
    %cst_9 = arith.constant dense<0.000000e+00> : vector<8x8xf32>
    %20 = tpu.matmul %0, %18, %cst_9 {dimension_numbers = #tpu.dot_dimension_numbers<[1], [0], [0], [1], [0, 0, 1, 1], [], []>} : vector<8x20xf32>, vector<20x8xf32>, vector<8x8xf32> -> vector<8x8xf32>
    %cst_10 = arith.constant dense<0.000000e+00> : vector<8xf32>
    %21 = vector.multi_reduction <add>, %19, %cst_10 [1] : vector<8x8xf32> to vector<8xf32>
    %22 = vector.shape_cast %21 : vector<8xf32> to vector<8x1xf32>
    %23 = arith.addf %1, %22 : vector<8x1xf32>
    %cst_11 = arith.constant dense<0.000000e+00> : vector<8xf32>
    %24 = vector.multi_reduction <add>, %20, %cst_11 [1] : vector<8x8xf32> to vector<8xf32>
    %25 = vector.shape_cast %24 : vector<8xf32> to vector<8x1xf32>
    %26 = arith.addf %23, %25 : vector<8x1xf32>
    %27 = arith.mulf %19, %19 : vector<8x8xf32>
    %cst_12 = arith.constant dense<0.000000e+00> : vector<8xf32>
    %28 = vector.multi_reduction <add>, %27, %cst_12 [1] : vector<8x8xf32> to vector<8xf32>
    %29 = vector.shape_cast %28 : vector<8xf32> to vector<8x1xf32>
    %30 = arith.addf %2, %29 : vector<8x1xf32>
    %31 = arith.mulf %20, %20 : vector<8x8xf32>
    %cst_13 = arith.constant dense<0.000000e+00> : vector<8xf32>
    %32 = vector.multi_reduction <add>, %31, %cst_13 [1] : vector<8x8xf32> to vector<8xf32>
    %33 = vector.shape_cast %32 : vector<8xf32> to vector<8x1xf32>
    %34 = arith.addf %30, %33 : vector<8x1xf32>
    %c0_14 = arith.constant 0 : index
    %c0_15 = arith.constant 0 : index
    %c0_16 = arith.constant 0 : index
    %35 = vector.load %arg4[%c0_14, %c0_15, %c0_16] : memref<1x8x1xf32, #tpu.memory_space<vmem>>, vector<1x8x1xf32>
    %36 = vector.shape_cast %35 : vector<1x8x1xf32> to vector<8x1xf32>
    %37 = vector.shape_cast %26 : vector<8x1xf32> to vector<1x8x1xf32>
    tpu.vector_store %arg4[%c0_14, %c0_15, %c0_16], %37 {strides = array<i32>} : memref<1x8x1xf32, #tpu.memory_space<vmem>>, vector<1x8x1xf32>,
    %c0_17 = arith.constant 0 : index
    %c0_18 = arith.constant 0 : index
    %c0_19 = arith.constant 0 : index
    %38 = vector.load %arg5[%c0_17, %c0_18, %c0_19] : memref<1x8x1xf32, #tpu.memory_space<vmem>>, vector<1x8x1xf32>
    %39 = vector.shape_cast %38 : vector<1x8x1xf32> to vector<8x1xf32>
    %40 = vector.shape_cast %34 : vector<8x1xf32> to vector<1x8x1xf32>
    tpu.vector_store %arg5[%c0_17, %c0_18, %c0_19], %40 {strides = array<i32>} : memref<1x8x1xf32, #tpu.memory_space<vmem>>, vector<1x8x1xf32>,
    return
  }
  func.func @transform_0(%arg0: i32) -> (i32, i32, i32) {
    %c0_i32 = arith.constant 0 : i32
    %c0_i32_0 = arith.constant 0 : i32
    %c0_i32_1 = arith.constant 0 : i32
    return %arg0, %c0_i32, %c0_i32_0 : i32, i32, i32
  }
  func.func @transform_1(%arg0: i32) -> (i32, i32, i32) {
    %c0_i32 = arith.constant 0 : i32
    %c0_i32_0 = arith.constant 0 : i32
    %c0_i32_1 = arith.constant 0 : i32
    return %arg0, %c0_i32, %c0_i32_0 : i32, i32, i32
  }
  func.func @transform_2(%arg0: i32) -> (i32, i32) {
    %c0_i32 = arith.constant 0 : i32
    %c0_i32_0 = arith.constant 0 : i32
    %c0_i32_1 = arith.constant 0 : i32
    return %c0_i32, %c0_i32_0 : i32, i32
  }
  func.func @transform_3(%arg0: i32) -> (i32, i32, i32) {
    %c0_i32 = arith.constant 0 : i32
    %c0_i32_0 = arith.constant 0 : i32
    %c0_i32_1 = arith.constant 0 : i32
    return %arg0, %c0_i32, %c0_i32_0 : i32, i32, i32
  }
  func.func @transform_4(%arg0: i32) -> (i32, i32, i32) {
    %c0_i32 = arith.constant 0 : i32
    %c0_i32_0 = arith.constant 0 : i32
    %c0_i32_1 = arith.constant 0 : i32
    return %arg0, %c0_i32, %c0_i32_0 : i32, i32, i32
  }
}

</mosaic_0001>

<bundles_post_ra>
// kernel: tpu_custom_call.1
= control target key start
LH: loop header
LB: loop body
LE: loop exit
PB: predicated region body
PF: predicated region fallthrough
CT: control target
= control target key end

     0   :  { %10 = vsyncpa [#allocation3], 0  ;;  %s1085_s0 = inlined_call_operand.hbm [shape: f32[2,4,10], index: 0, kind: input, shape index: {}]   ;;  %s1086_s1 = inlined_call_operand.hbm [shape: f32[2,4,10], index: 1, kind: input, shape index: {}]   ;;  %s1087_s2 = inlined_call_operand.hbm [shape: f32[8,20], index: 2, kind: input, shape index: {}]   ;;  %s1088_s3 = inlined_call_operand.vmem [shape: f32[2,8,1], index: 3, kind: output, shape index: {0}]   ;;  %s1089_s4 = inlined_call_operand.vmem [shape: f32[2,8,1], index: 4, kind: output, shape index: {1}]  }
   0x1   :  { %12 = vsyncpa [#allocation3 + $0x1], 0 }
   0x2   :  { %13 = vsyncpa [#allocation5], 0 }
   0x3   :  { %15 = vsyncpa [#allocation5 + $0x1], 0  ;;  %s890_s15 = smov 0   ;;  %s892_s16 = smov 0  }
   0x4   :  { %s894_s17 = smov 0   ;;  %s896_s18 = smov 0  }
   0x5 LB: > { %s909_s19 = sadd.s32 4294967295, %s855_s18   ;;  %p41_p0 = scmp.ne.s32.totalorder %s847_s16, %s843_s15  ;;  %s855_s18 = sphi %s896_s18, %s1107_s18   ;;  %s851_s17 = sphi %s894_s17, %s1106_s17   ;;  %s847_s16 = sphi %s892_s16, %s1105_s16   ;;  %s843_s15 = sphi %s890_s15, %s1104_s15  }
   0x6   : > { %p1090_p1 = scmp.eq.s32.totalorder %s909_s19, 0  ;;  %p604_p2 = scmp.ge.s32.totalorder %s855_s18, 1 }
   0x7   : > { %p151_p3 = scmp.lt.s32.totalorder %s855_s18, 3  ;;  %s857_s22 = smov [#allocation6]  }
   0x8   : > { %p917_p4 = por %p1090_p1, %p41_p0  ;;  %s164_s23 = sshll.u32 %s857_s22, 4  ;;  %s165_s23 = int_to_ptr.vmem [resolvable:$true] %s164_s23 }
   0x9   : > { %p921_p5 = pnand %p604_p2, %p151_p3  ;;  %s928_s24 = sadd.s32 1, %s855_s18  }
   0xa   : > { %s1093_s20 = scalar_select %p917_p4, 1, 0 }
   0xb   : > { %s1094_s21 = scalar_select %p921_p5, 1, 0 }
   0xc   : > { %p663_p6 = pneg %p921_p5  ;;  %s25_s26 = ssub.s32 %s855_s18, %s928_s24 }
   0xd   : > { %p938_p8 = scmp.eq.s32.totalorder %s25_s26, 0  ;;  %s28_s28 = sadd.s32 1, %s851_s17 }
   0xe   : > { %p932_p7 = pnand %p663_p6, %p1090_p1  ;;  %s725_s5 = scalar_lea.hbm %s1087_s2, 128 }
   0xf   : > { %s1096_s27 = scalar_select %p938_p8, 1, 0 }
  0x10   : > { %p726_p10 = scmp.ne.s32.totalorder %s1087_s2, %s725_s5  ;;  %p727_p11 = pneg %p932_p7 }
  0x11   : > { %p732_p0 = scmp.lt.u32.totalorder %s725_s5, %s1087_s2 }
  0x12   : > { %p728_p12 = pnand %p727_p11, %p726_p10 }
  0x14   : > { %p729_p13 = pneg %p728_p12 }
  0x16   : > { %p734_p2 = pnand %p732_p0, %p729_p13 }
  0x18   : > { %737 = shalt.err (!%p734_p2)
}
  0x19   : > { %s738_s10 = scalar_lea.vmem %s165_s23, 128  ;;  %p746_p9 = scmp.lt.s32.totalorder %s165_s23, %s165_s23 }
  0x1a   : > { %p739_p3 = scmp.ne.s32.totalorder %s165_s23, %s738_s10  ;;  %p747_p4 = scmp.lt.s32.totalorder %s738_s10, %s738_s10 }
  0x1c   : > { %p741_p6 = pnand %p739_p3, %p727_p11  ;;  %p748_p5 = por %p747_p4, %p746_p9 }
  0x1e   : > { %p742_p1 = pneg %p741_p6 }
  0x20   : > { %p749_p8 = pnand %p748_p5, %p742_p1 }
  0x22   : > { %752 = shalt.err (!%p749_p8)
}
  0x23   : > { %666 = dma.hbm_to_vmem [thread:$0]  (!%p932_p7), %s1087_s2, 128, %s165_s23, [#allocation5]  }
  0x24   : > { %p1097_p10 = scmp.ne.s32.totalorder %s1096_s27, 0  ;;  %p36_p1 = scmp.eq.s32.totalorder %s855_s18, 0 }
  0x25   : > { %p675_p4 = scmp.lt.s32.totalorder %s855_s18, 2  ;;  %s175_s14 = sand.u32 1, %s851_s17  }
  0x26   : > { %s964_s13 = scalar_select %p1097_p10, %s851_s17, %s28_s28  }
  0x27   : > { %s608_s15 = sshll.u32 %s855_s18, 6  ;;  %p1098_p5 = scmp.ne.s32.totalorder %s851_s17, %s847_s16 }
  0x28   : > { %s973_s22 = sshll.u32 %s175_s14, 2  ;;  %s980_s29 = scalar_lea.hbm %s1085_s0, %s608_s15 }
  0x29   : > { %p37_p8 = por %p36_p1, %p1098_p5  ;;  %s179_s27 = scalar_lea.vmem [#allocation2], %s973_s22 }
  0x2a   : > { %s186_s28 = sshll.u32 %s179_s27, 4  ;;  %s176_s30 = scalar_lea.sflag [#allocation3], %s175_s14  ;;  %s987_s28 = int_to_ptr.vmem [resolvable:$true] %s186_s28 }
  0x2b   : > { %p982_p7 = pnand %p675_p4, %p37_p8  ;;  %s753_s5 = scalar_lea.hbm %s980_s29, 64 }
  0x2c   : > { %p754_p9 = scmp.ne.s32.totalorder %s980_s29, %s753_s5  ;;  %s758_s8 = scalar_lea.hbm %s1085_s0, 128 }
  0x2d   : > { %p755_p11 = pneg %p982_p7  ;;  %p759_p0 = scmp.lt.u32.totalorder %s980_s29, %s1085_s0 }
  0x2e   : > { %p760_p2 = scmp.lt.u32.totalorder %s758_s8, %s753_s5  ;;  %p762_p6 = scmp.lt.u32.totalorder %s753_s5, %s980_s29 }
  0x2f   : > { %p756_p12 = pnand %p755_p11, %p754_p9 }
  0x30   : > { %p761_p3 = por %p760_p2, %p759_p0 }
  0x31   : > { %p757_p13 = pneg %p756_p12 }
  0x32   : > { %p763_p10 = por %p762_p6, %p761_p3 }
  0x34   : > { %p764_p1 = pnand %p763_p10, %p757_p13 }
  0x36   : > { %767 = shalt.err (!%p764_p1)
}
  0x37   : > { %s768_s11 = scalar_lea.vmem %s987_s28, 64  ;;  %s858_s12 = smov [#allocation2]  }
  0x38   : > { %p769_p4 = scmp.ne.s32.totalorder %s987_s28, %s768_s11  ;;  %s773_s14 = sshll.u32 %s858_s12, 4  ;;  %s774_s14 = int_to_ptr.vmem [resolvable:$false] %s773_s14 }
  0x39   : > { %s775_s25 = scalar_lea.vmem %s774_s14, 128  ;;  %p776_p9 = scmp.lt.s32.totalorder %s987_s28, %s774_s14 }
  0x3a   : > { %p771_p5 = pnand %p769_p4, %p755_p11  ;;  %p777_p12 = scmp.lt.s32.totalorder %s775_s25, %s768_s11 }
  0x3c   : > { %p772_p8 = pneg %p771_p5  ;;  %p778_p0 = por %p777_p12, %p776_p9 }
  0x3e   : > { %p779_p2 = pnand %p778_p0, %p772_p8 }
  0x40   : > { %782 = shalt.err (!%p779_p2)
}
  0x41   : > { %670 = dma.hbm_to_vmem [thread:$0]  (!%p982_p7), %s980_s29, 64, %s987_s28, %s176_s30  }
  0x42   : > { %s1019_s5 = scalar_lea.hbm %s1086_s1, %s608_s15  ;;  %s193_s6 = sand.u32 1, %s855_s18  }
  0x43   : > { %s197_s7 = scalar_lea.vmem [#allocation4], %s973_s22  ;;  %s194_s9 = scalar_lea.sflag [#allocation5], %s193_s6 }
  0x44   : > { %s204_s8 = sshll.u32 %s197_s7, 4  ;;  %s783_s10 = scalar_lea.hbm %s1019_s5, 64  ;;  %s205_s8 = int_to_ptr.vmem [resolvable:$true] %s204_s8 }
  0x45   : > { %p784_p13 = scmp.ne.s32.totalorder %s1019_s5, %s783_s10  ;;  %s788_s15 = scalar_lea.hbm %s1086_s1, 128 }
  0x46   : > { %p789_p10 = scmp.lt.u32.totalorder %s1019_s5, %s1086_s1  ;;  %p790_p1 = scmp.lt.u32.totalorder %s788_s15, %s783_s10 }
  0x47   : > { %p786_p3 = pnand %p784_p13, %p755_p11  ;;  %p792_p5 = scmp.lt.u32.totalorder %s783_s10, %s1019_s5 }
  0x48   : > { %p791_p4 = por %p790_p1, %p789_p10 }
  0x49   : > { %p787_p6 = pneg %p786_p3 }
  0x4a   : > { %p793_p8 = por %p792_p5, %p791_p4 }
  0x4c   : > { %p794_p9 = pnand %p793_p8, %p787_p6 }
  0x4e   : > { %797 = shalt.err (!%p794_p9)
}
  0x4f   : > { %s798_s18 = scalar_lea.vmem %s205_s8, 64  ;;  %s859_s22 = smov [#allocation4]  }
  0x50   : > { %p799_p12 = scmp.ne.s32.totalorder %s205_s8, %s798_s18  ;;  %s803_s12 = sshll.u32 %s859_s22, 4  ;;  %s804_s12 = int_to_ptr.vmem [resolvable:$false] %s803_s12 }
  0x51   : > { %s805_s14 = scalar_lea.vmem %s804_s12, 128  ;;  %p806_p13 = scmp.lt.s32.totalorder %s205_s8, %s804_s12 }
  0x52   : > { %p801_p0 = pnand %p799_p12, %p755_p11  ;;  %p807_p3 = scmp.lt.s32.totalorder %s805_s14, %s798_s18 }
  0x54   : > { %p802_p2 = pneg %p801_p0  ;;  %p808_p1 = por %p807_p3, %p806_p13 }
  0x56   : > { %p809_p10 = pnand %p808_p1, %p802_p2 }
  0x58   : > { %812 = shalt.err (!%p809_p10)
}
  0x59   : > { %673 = dma.hbm_to_vmem [thread:$0]  (!%p982_p7), %s1019_s5, 64, %s205_s8, %s194_s9  }
  0x5a   : > { %p1100_p6 = scmp.ne.s32.totalorder %s1094_s21, 0 }
  0x5b   : > { %s215_s25 = sand.u32 (!%p1100_p6), 1, %s847_s16   ;;  %p1101_p11 = scmp.ne.s32.totalorder (!%p1100_p6), %s1093_s20, 0 }
  0x5c   : > { %213 = sbr.rel (%p1100_p6) target bundleno = 602 (0x25a), region = 32  ;;  %s612_s26 = sshll.u32 (!%p1100_p6), %s215_s25, 2 }
  0x5d   : > { %s216_s27 = scalar_lea.sflag (!%p1100_p6), [#allocation3], %s215_s25  ;;  %s219_s6 = scalar_lea.vmem (!%p1100_p6), [#allocation2], %s612_s26 }
  0x63   : > { %830 = dma.done.wait (%p1101_p11), %s216_s27, 64  }
  0x64   : > { %832 = vsyncadd (%p1101_p11), %s216_s27, 4294967232  ;;  %s224_s7 = sand.u32 1, %s909_s19   ;;  %s228_s10 = scalar_lea.vmem [#allocation4], %s612_s26 }
  0x65   : > { %s225_s23 = scalar_lea.sflag [#allocation5], %s224_s7 }
  0x66   : > { %834 = dma.done.wait (%p1101_p11), %s225_s23, 64  }
  0x67   : > { %836 = vsyncadd (%p1101_p11), %s225_s23, 4294967232  ;;  %p1102_p7 = scmp.eq.s32.totalorder %s909_s19, 0 }
  0x69   : > { %838 = dma.done.wait (%p1102_p7), [#allocation5], 128   ;;  %p1103_p4 = pmov %p1102_p7 }
  0x6a   : > { %v860_v0 = vmov 0.0|0.0   ;;  %v274_v1 = vld [vmem:[%s219_s6] sm:$0xf]  ;;  %v275_v2 = vld [vmem:[%s228_s10] sm:$0xf]  ;;  %vm288_vm0 = vcmask 1043456  }
  0x6b   : > { %840 = vsyncadd (%p1103_p4), [#allocation5], 4294967168  ;;  %649 = vmatprep.subr.bf16.mxu0 %v860_v0  ;;  %652 = vmatprep.subr.bf16.mxu1 %v860_v0  ;;  %v277_v3 = vrot.slane %v275_v2, 4  ;;  %v291_v4 = vrot.slane %v274_v1, 4  ;;  %vm861_vm1 = vmmov 0   ;;  %v862_v5 = vmov 0.0  }
  0x6c   : > { %637 = vmatprep.mubr.msk.f32.mxu0 %vm861_vm1, %v862_v5  ;;  %646 = vmatprep.mubr.msk.f32.mxu1 %vm861_vm1, %v862_v5  ;;  %s863_s20 = smov 126   ;;  %s864_s21 = smov 127   ;;  %v273_v22 = vld [vmem:[#allocation6] sm:$0xff]  ;;  %vm305_vm2 = vcmask 162816   ;;  %vm453_vm3 = vcmask 64512   ;;  %vm472_vm4 = vcmask 7168  }
  0x6d   : > { %v715_v6 = vpack.i.bf16 %v277_v3, %v274_v1  ;;  %298 = vrot.lane.b32.xlu1 %v291_v4, %s863_s20  ;;  %v289_v7 = vsel %vm288_vm0, %v274_v1, %v277_v3  ;;  %v720_v8 = vpack.i.bf16 %v275_v2, %v291_v4  ;;  %p265_p5 = scmp.lt.s32.totalorder %s909_s19, 1 }
  0x6f   : > { %716 = vrot.lane.b32.xlu0 %v715_v6, %s864_s21  ;;  %s1109_s19 = smov (!%p265_p5, %s909_s19), 1 }
  0x70   : > { %s615_s5 = sshll.u32 %s1109_s19, 3 }
  0x71   : > { %286 = vrot.lane.b32.xlu1 %v274_v1, %s863_s20  ;;  %s268_s29 = scalar_lea.vmem %s1088_s3, %s615_s5  ;;  %s272_s30 = scalar_lea.vmem %s1089_s4, %s615_s5 }
  0x73   : > { %721 = vrot.lane.b32.xlu0 %v720_v8, %s864_s21 }
  0x77   : > { %301 = vrot.lane.b32.xlu0 %v275_v2, %s863_s20 }
  0xdf   : > { %v299_v12 = vpop.permute.xlu1 %298 }
  0xe1   : > { %v717_v9 = vpop.permute.xlu0 %716 }
  0xe2   : > { %v719_v10 = vunpack.i.h.bf16 %v717_v9  ;;  %v718_v11 = vunpack.i.l.bf16 %v717_v9 }
  0xe3   : > { %v287_v20 = vpop.permute.xlu1 %286 }
  0xe4   : > { %v290_v13 = vsel %vm288_vm0, %v718_v11, %v719_v10 }
  0xe5   : > { %v722_v14 = vpop.permute.xlu0 %721  ;;  %v650_v15 = vpack.c.bf16 %v290_v13, %v289_v7 }
  0xe6   : > { %v724_v16 = vunpack.i.h.bf16 %v722_v14  ;;  %v723_v17 = vunpack.i.l.bf16 %v722_v14 }
  0xe7   : > { %651 = vmatpush3.bf16.msra.mxu0 %v650_v15 }
  0xe8   : > { %v304_v18 = vsel %vm288_vm0, %v724_v16, %v299_v12  ;;  %v303_v19 = vsel %vm288_vm0, %v275_v2, %v723_v17  ;;  %635 = vmatprep.subr.mxu0 %v862_v5 }
  0xe9   : > { %v653_v21 = vpack.c.bf16 %v304_v18, %v303_v19  ;;  %v302_v23 = vpop.permute.xlu0 %301 }
  0xeb   : > { %654 = vmatpush3.bf16.msra.mxu1 %v653_v21  ;;  %636 = vmatpush3.msk.msra.mxu0 %vm288_vm0, %v287_v20 }
  0xec   : > { %638 = vmatmul.mubr.msk.f32.vlgmr.msra.gmra.mrb[0].mxu0 %vm305_vm2, %v273_v22  ;;  %644 = vmatprep.subr.mxu1 %v862_v5 }
  0xef   : > { %645 = vmatpush3.msk.msra.mxu1 %vm288_vm0, %v302_v23 }
  0xf0   : > { %647 = vmatmul.mubr.msk.f32.vlgmr.msra.gmra.mrb[0].mxu1 %vm305_vm2, %v273_v22 }
 0x1bf   : > { %v377_v24 = vpop.f32.mrb[0].mxu0 }
 0x1c0   : > { %v454_v25 = vsel %vm453_vm3, %v377_v24, 0.0  ;;  %v639_v26 = vpop.f32.mrb[1].mxu0  ;;  %v462_v28 = vmul.f32 %v377_v24, %v377_v24 }
 0x1c1   : > { %455 = vadd.xlane.f32.xlu1 %v454_v25 }
 0x1c2   : > { %v463_v33 = vsel %vm453_vm3, %v462_v28, 0.0 }
 0x1c3   : > { %v449_v27 = vpop.f32.mrb[0].mxu1 }
 0x1c4   : > { %v467_v29 = vmul.f32 %v449_v27, %v449_v27  ;;  %v648_v30 = vpop.f32.mrb[1].mxu1  ;;  %v458_v31 = vsel %vm453_vm3, %v449_v27, 0.0 }
 0x1c5   : > { %459 = vadd.xlane.f32.xlu0 %v458_v31 }
 0x1c6   : > { %v468_v32 = vsel %vm453_vm3, %v467_v29, 0.0 }
 0x1c7   : > { %469 = vadd.xlane.f32.xlu1 %v468_v32 }
 0x1c9   : > { %464 = vadd.xlane.f32.xlu0 %v463_v33 }
 0x24e   : > { %v456_v34 = vpop.xlane.xlu1 %455 }
 0x252   : > { %v460_v35 = vpop.xlane.xlu0 %459 }
 0x253   : > { %v461_v36 = vadd.f32 %v460_v35, %v456_v34 }
 0x254   : > { %v470_v37 = vpop.xlane.xlu1 %469 }
 0x255   : > { %473 = vst.msk [vmem:[%s268_s29] sm:$0xff] %vm472_vm4, %v461_v36 }
 0x256   : > { %v465_v38 = vpop.xlane.xlu0 %464 }
 0x257   : > { %v471_v39 = vadd.f32 %v470_v37, %v465_v38 }
 0x259   : > { %474 = vst.msk [vmem:[%s272_s30] sm:$0xff] %vm472_vm4, %v471_v39 }
 0x25a PF: > { %p18_p8 = scmp.ge.s32.totalorder %s928_s24, 4   ;;  %s1104_s15 = smov %s847_s16 }
 0x25b   : > { %s1105_s16 = smov %s851_s17  ;;  %s1106_s17 = smov %s964_s13 }
 0x25c   : > { %s1107_s18 = smov %s928_s24  ;;  %20 = sbr.rel (!%p18_p8) target bundleno = 5 (0x5), region = 101 }
 0x263   :  { %508 = vsyncpa [#allocation3], 1 }
 0x264   :  { %510 = vsyncpa [#allocation3 + $0x1], 1 }
 0x265   :  { %511 = vsyncpa [#allocation5], 1 }
 0x266   :  { %513 = vsyncpa [#allocation5 + $0x1], 1 }

</bundles_post_ra>
